<compile_context>
chip_gen: v7x
topology: tpu7x:2x2x1
jax: 0.10.0
libtpu: 0.0.40
codegen_flags: <defaults>
</compile_context>

<pallas_src>
from typing import NamedTuple

import jax
import jax.numpy as jnp
from jax.experimental import pallas as pl
from jax.experimental.pallas import tpu as pltpu


def _round_up(n, m):
    return ((n + m - 1) // m) * m


def ngram_kernel(ids_ref, emb_ref, w1_ref, b1_ref, w2_ref, b2_ref, out_ref):
    # ids_ref: (TM, C)       int32 token ids (streamed row tile)
    # emb_ref: (V_rows, E)   embedding table (VMEM-resident)
    # w1_ref:  (C, E, H_P)   linear1 weight split per context slot (resident)
    # b1_ref:  (1, H_P)      f32
    # w2_ref:  (H_P, V_P)    linear2 weight (resident)
    # b2_ref:  (1, V_P)      f32; padded vocab lanes hold -1e30
    # out_ref: (TM, V_P)     log-probabilities
    tm, c_size = ids_ref.shape
    vocab_rows = emb_ref.shape[0]

    ids = ids_ref[...]                       # (TM, C) int32
    emb = emb_ref[...]                       # (V_rows, E)

    # linear1 accumulated per context slot: x @ W1 == sum_c gather_c @ W1[c].
    # The gather itself is an exact one-hot MXU matmul (0/1 times table rows).
    acc = b1_ref[...].astype(jnp.float32)    # (1, H_P), broadcasts over rows
    lane_ids = jax.lax.broadcasted_iota(jnp.int32, (tm, vocab_rows), 1)
    for c in range(c_size):                  # static unroll; C is tiny
        ids_c = ids[:, c:c + 1]              # (TM, 1)
        onehot = (ids_c == lane_ids).astype(emb.dtype)        # (TM, V_rows)
        x_c = jnp.dot(onehot, emb, preferred_element_type=jnp.float32)
        acc = acc + jnp.dot(x_c.astype(w1_ref.dtype), w1_ref[c],
                            preferred_element_type=jnp.float32)

    h = jnp.maximum(acc, 0.0)                # relu, f32

    # linear2 (f32 accumulation on the MXU), bias in f32.
    logits = (
        jnp.dot(h.astype(w2_ref.dtype), w2_ref[...],
                preferred_element_type=jnp.float32)
        + b2_ref[...]
    )

    # Numerically stable log_softmax along the lane axis. Padded vocab lanes
    # carry a -1e30 bias so exp() of them is exactly 0.
    m = jnp.max(logits, axis=-1, keepdims=True)
    shifted = logits - m
    lse = jnp.log(jnp.sum(jnp.exp(shifted), axis=-1, keepdims=True))
    out_ref[...] = (shifted - lse).astype(out_ref.dtype)


class NGramParams(NamedTuple):
    emb: jax.Array     # (vocab, E)        param dtype (bf16 default)
    w1: jax.Array      # (C, E, H_P)       param dtype
    b1: jax.Array      # (1, H_P)          f32
    w2: jax.Array      # (H_P, V_P)        param dtype
    b2: jax.Array      # (1, V_P)          f32, -1e30 in padded lanes
    vocab: int
    context: int


def prepare_params(emb_table, w1, b1, w2, b2, param_dtype=jnp.bfloat16):
    """Pad / cast the weights ONCE (call at init, reuse every forward).

    Layouts (transposed vs torch): w1 (C*E, hidden), b1 (hidden,)|(1,hidden),
    w2 (hidden, vocab), b2 (vocab,)|(1,vocab). emb_table (vocab, E).
    """
    vocab, e_dim = emb_table.shape
    in_dim, hidden = w1.shape
    context = in_dim // e_dim
    assert context * e_dim == in_dim
    assert w2.shape[0] == hidden and w2.shape[1] == vocab

    h_p = _round_up(hidden, 128)
    v_p = _round_up(vocab, 128)
    f32 = jnp.float32

    emb_p = emb_table.astype(param_dtype)
    w1_p = (jnp.zeros((context, e_dim, h_p), param_dtype)
            .at[:, :, :hidden].set(w1.reshape(context, e_dim, hidden)
                                   .astype(param_dtype)))
    b1_p = jnp.zeros((1, h_p), f32).at[:, :hidden].set(
        b1.reshape(-1)[None, :].astype(f32))
    w2_p = (jnp.zeros((h_p, v_p), param_dtype)
            .at[:hidden, :vocab].set(w2.astype(param_dtype)))
    # Padded vocab lanes get a huge negative bias so they vanish in softmax.
    b2_p = jnp.full((1, v_p), -1e30, f32).at[:, :vocab].set(
        b2.reshape(-1)[None, :].astype(f32))
    return NGramParams(emb_p, w1_p, b1_p, w2_p, b2_p, vocab, context)


def ngram_forward(inputs, params: NGramParams, *, tile_m=None,
                  out_dtype=jnp.float32):
    """Forward pass of the n-gram LM.

    inputs: (C,) int32 ids -> (1, V) (exact torch semantics), or
            (B, C) int32 ids -> (B, V) (batched).
    """
    single = inputs.ndim == 1
    ids = inputs[None, :] if single else inputs
    B, C = ids.shape
    assert C == params.context
    vocab = params.vocab
    v_rows, e_dim = params.emb.shape
    h_p = params.b1.shape[1]
    v_p = params.b2.shape[1]

    # --- tile selection -----------------------------------------------------
    TILE_CAP = 512
    if tile_m is None:
        if B <= TILE_CAP:
            tile_m = _round_up(B, 8)           # one grid step covers the batch
        else:
            steps = -(-B // TILE_CAP)
            if steps % 2:                      # even grid: balanced 2-TC split
                steps += 1
            tile_m = _round_up(-(-B // steps), 8)
    else:
        tile_m = _round_up(tile_m, 8)
    b_pad = _round_up(B, tile_m)
    grid = (b_pad // tile_m,)

    ids = ids.astype(jnp.int32)
    if b_pad != B:
        ids = jnp.pad(ids, ((0, b_pad - B), (0, 0)))   # pad rows use id 0

    # --- VMEM budget / cost hints -------------------------------------------
    def _nbytes(a):
        return a.size * a.dtype.itemsize

    weight_bytes = (_nbytes(params.emb) + _nbytes(params.w1) +
                    _nbytes(params.b1) + _nbytes(params.w2) +
                    _nbytes(params.b2))
    out_itemsize = jnp.dtype(out_dtype).itemsize
    stream_bytes = tile_m * C * 4 + tile_m * v_p * out_itemsize
    vmem_limit = 2 * (2 * weight_bytes + 2 * stream_bytes) + (4 << 20)
    vmem_limit = int(min(max(vmem_limit, 16 << 20), 64 << 20))

    cost = pl.CostEstimate(
        flops=2 * b_pad * (C * vocab * e_dim + C * e_dim * h_p + h_p * v_p),
        transcendentals=b_pad * v_p,  # exp in log_softmax
        bytes_accessed=(weight_bytes + b_pad * C * 4
                        + b_pad * v_p * out_itemsize),
    )

    # --- kernel call ----------------------------------------------------------
    # Resident arrays (constant index_map) are DMA'd once and reused every
    # grid step.
    # TODO(synk): on v7x at realistic vocab, mark the resident weight specs
    # pipeline_mode=pl.Buffered(1) and tile the vocab axis (two-pass softmax).
    out = pl.pallas_call(
        ngram_kernel,
        out_shape=jax.ShapeDtypeStruct((b_pad, v_p), out_dtype),
        grid=grid,
        in_specs=[
            pl.BlockSpec((tile_m, C), lambda i: (i, 0)),        # ids (streamed)
            pl.BlockSpec(params.emb.shape, lambda i: (0, 0)),   # emb (resident)
            pl.BlockSpec(params.w1.shape, lambda i: (0, 0, 0)), # w1  (resident)
            pl.BlockSpec(params.b1.shape, lambda i: (0, 0)),    # b1  (resident)
            pl.BlockSpec(params.w2.shape, lambda i: (0, 0)),    # w2  (resident)
            pl.BlockSpec(params.b2.shape, lambda i: (0, 0)),    # b2  (resident)
        ],
        out_specs=pl.BlockSpec((tile_m, v_p), lambda i: (i, 0)),
        compiler_params=pltpu.CompilerParams(
            dimension_semantics=("parallel",),
            vmem_limit_bytes=vmem_limit,
        ),
        cost_estimate=cost,
    )(ids, params.emb, params.w1, params.b1, params.w2, params.b2)

    out = out[:B, :vocab]
    if single:
        out = out[:1]
    return out


def init_params(key, vocab_size, embedding_dim, context_size, hidden=128):
    k_emb, k_w1, k_b1, k_w2, k_b2 = jax.random.split(key, 5)
    in_dim = context_size * embedding_dim
    # Embedding: N(0,1) like torch.nn.Embedding default.
    emb_table = jax.random.normal(k_emb, (vocab_size, embedding_dim), jnp.float32)
    # Linear layers: U(-1/sqrt(fan_in), 1/sqrt(fan_in)) like torch.nn.Linear,
    # stored transposed as (in, out) for the kernel layout.
    bound1 = 1.0 / jnp.sqrt(in_dim)
    w1 = jax.random.uniform(k_w1, (in_dim, hidden), jnp.float32, -bound1, bound1)
    b1 = jax.random.uniform(k_b1, (1, hidden), jnp.float32, -bound1, bound1)
    bound2 = 1.0 / jnp.sqrt(hidden)
    w2 = jax.random.uniform(k_w2, (hidden, vocab_size), jnp.float32, -bound2, bound2)
    b2 = jax.random.uniform(k_b2, (1, vocab_size), jnp.float32, -bound2, bound2)
    return emb_table, w1, b1, w2, b2


if __name__ == "__main__":
    # Small, deliberately non-128-aligned shapes to exercise the padding path.
    vocab_size = 97
    embedding_dim = 10
    context_size = 2      # -> in_dim = 20
    hidden = 128

    key = jax.random.PRNGKey(0)
    k_params, k_in1, k_inB, k_inL = jax.random.split(key, 4)
    emb_table, w1, b1, w2, b2 = init_params(
        k_params, vocab_size, embedding_dim, context_size, hidden
    )

    def ref_forward(ids2d, emb, w1_, b1_, w2_, b2_):
        e = jnp.take(emb, ids2d.reshape(-1), axis=0).reshape(ids2d.shape[0], -1)
        hh = jnp.maximum(e @ w1_ + b1_, 0.0)
        return jax.nn.log_softmax(hh @ w2_ + b2_, axis=1)

    # Pad/cast the weights ONCE (per the review), then reuse across calls.
    params_f32 = prepare_params(emb_table, w1, b1, w2, b2,
                                param_dtype=jnp.float32)
    params_bf16 = prepare_params(emb_table, w1, b1, w2, b2)   # bf16 default

    # 1) single context, f32 (exact module semantics: (C,) -> (1, V))
    ids = jax.random.randint(k_in1, (context_size,), 0, vocab_size, jnp.int32)
    lp = jax.block_until_ready(ngram_forward(ids, params_f32))
    ref = ref_forward(ids[None, :], emb_table, w1, b1, w2, b2)
    assert lp.shape == (1, vocab_size)
    assert jnp.allclose(lp, ref, atol=1e-4, rtol=1e-4)
    assert jnp.allclose(jnp.sum(jnp.exp(lp)), 1.0, atol=1e-4)

    # 2) batched contexts, f32, default tile -> single grid step covers batch
    B = 48
    ids_b = jax.random.randint(k_inB, (B, context_size), 0, vocab_size, jnp.int32)
    lp_b = jax.block_until_ready(ngram_forward(ids_b, params_f32))
    ref_b = ref_forward(ids_b, emb_table, w1, b1, w2, b2)
    assert lp_b.shape == (B, vocab_size)
    assert jnp.allclose(lp_b, ref_b, atol=1e-4, rtol=1e-4)

    # 3) multi-step grid with an EVEN number of steps (v7x 2-TC split),
    #    weights VMEM-resident across steps.
    B2 = 96
    ids_l = jax.random.randint(k_inL, (B2, context_size), 0, vocab_size, jnp.int32)
    lp_l = jax.block_until_ready(ngram_forward(ids_l, params_f32, tile_m=48))
    ref_l = ref_forward(ids_l, emb_table, w1, b1, w2, b2)
    assert lp_l.shape == (B2, vocab_size)
    assert jnp.allclose(lp_l, ref_l, atol=1e-4, rtol=1e-4)

    # 4) default bf16 weight/embedding storage (MXU fast path), f32 accumulation
    #    and f32 epilogue.
    lp_bf = jax.block_until_ready(ngram_forward(ids_b, params_bf16))
    assert lp_bf.shape == (B, vocab_size)
    assert bool(jnp.all(jnp.isfinite(lp_bf)))
    assert jnp.allclose(lp_bf, ref_b, atol=1e-1)

    print("KERNEL_OK")
</pallas_src>

<mosaic_0001>
module attributes {stable_mosaic.version = 11 : i64} {
  func.func @ngram_kernel(%arg0: i32, %arg1: memref<8x2xi32, #tpu.memory_space<vmem>>, %arg2: memref<97x10xf32, #tpu.memory_space<vmem>>, %arg3: memref<2x10x128xf32, #tpu.memory_space<vmem>>, %arg4: memref<1x128xf32, #tpu.memory_space<vmem>>, %arg5: memref<128x128xf32, #tpu.memory_space<vmem>>, %arg6: memref<1x128xf32, #tpu.memory_space<vmem>>, %arg7: memref<8x128xf32, #tpu.memory_space<vmem>>) attributes {dimension_semantics = [#tpu.dimension_semantics<parallel>], iteration_bounds = array<i64: 1>, scalar_prefetch = 0 : i64, scratch_operands = 0 : i64, tpu.core_type = #tpu.core_type<tc>, window_params = [{transform_indices = @transform_0, window_bounds = array<i64: 8, 2>}, {pipeline_mode = #tpu.pipeline_mode<synchronous>, transform_indices = @transform_1, window_bounds = array<i64: 97, 10>}, {pipeline_mode = #tpu.pipeline_mode<synchronous>, transform_indices = @transform_2, window_bounds = array<i64: 2, 10, 128>}, {pipeline_mode = #tpu.pipeline_mode<synchronous>, transform_indices = @transform_3, window_bounds = array<i64: 1, 128>}, {pipeline_mode = #tpu.pipeline_mode<synchronous>, transform_indices = @transform_4, window_bounds = array<i64: 128, 128>}, {pipeline_mode = #tpu.pipeline_mode<synchronous>, transform_indices = @transform_5, window_bounds = array<i64: 1, 128>}, {transform_indices = @transform_6, window_bounds = array<i64: 8, 128>}]} {
    %c0 = arith.constant 0 : index
    %c0_0 = arith.constant 0 : index
    %0 = vector.load %arg1[%c0, %c0_0] : memref<8x2xi32, #tpu.memory_space<vmem>>, vector<8x2xi32>
    %c0_1 = arith.constant 0 : index
    %c0_2 = arith.constant 0 : index
    %1 = vector.load %arg2[%c0_1, %c0_2] : memref<97x10xf32, #tpu.memory_space<vmem>>, vector<97x10xf32>
    %c0_3 = arith.constant 0 : index
    %c0_4 = arith.constant 0 : index
    %2 = vector.load %arg4[%c0_3, %c0_4] : memref<1x128xf32, #tpu.memory_space<vmem>>, vector<1x128xf32>
    %3 = tpu.iota {dimensions = array<i32: 1>} : vector<8x97xi32>
    %4 = vector.extract_strided_slice %0 {offsets = [0, 0], sizes = [8, 1], strides = [1, 1]} : vector<8x2xi32> to vector<8x1xi32>
    %5 = vector.broadcast %4 : vector<8x1xi32> to vector<8x97xi32>
    %6 = arith.cmpi eq, %5, %3 : vector<8x97xi32>
    %7 = arith.extui %6 : vector<8x97xi1> to vector<8x97xi32>
    %8 = arith.sitofp %7 : vector<8x97xi32> to vector<8x97xf32>
    %cst = arith.constant dense<0.000000e+00> : vector<8x10xf32>
    %9 = tpu.matmul %8, %1, %cst {dimension_numbers = #tpu.dot_dimension_numbers<[1], [0], [0], [1], [0, 0, 1, 1], [], []>} : vector<8x97xf32>, vector<97x10xf32>, vector<8x10xf32> -> vector<8x10xf32>
    %c0_5 = arith.constant 0 : index
    %c0_6 = arith.constant 0 : index
    %c0_7 = arith.constant 0 : index
    %10 = vector.load %arg3[%c0_5, %c0_6, %c0_7] : memref<2x10x128xf32, #tpu.memory_space<vmem>>, vector<1x10x128xf32>
    %11 = vector.shape_cast %10 : vector<1x10x128xf32> to vector<10x128xf32>
    %cst_8 = arith.constant dense<0.000000e+00> : vector<8x128xf32>
    %12 = tpu.matmul %9, %11, %cst_8 {dimension_numbers = #tpu.dot_dimension_numbers<[1], [0], [0], [1], [0, 0, 1, 1], [], []>} : vector<8x10xf32>, vector<10x128xf32>, vector<8x128xf32> -> vector<8x128xf32>
    %13 = vector.broadcast %2 : vector<1x128xf32> to vector<8x128xf32>
    %14 = arith.addf %13, %12 : vector<8x128xf32>
    %15 = vector.extract_strided_slice %0 {offsets = [0, 1], sizes = [8, 1], strides = [1, 1]} : vector<8x2xi32> to vector<8x1xi32>
    %16 = vector.broadcast %15 : vector<8x1xi32> to vector<8x97xi32>
    %17 = arith.cmpi eq, %16, %3 : vector<8x97xi32>
    %18 = arith.extui %17 : vector<8x97xi1> to vector<8x97xi32>
    %19 = arith.sitofp %18 : vector<8x97xi32> to vector<8x97xf32>
    %cst_9 = arith.constant dense<0.000000e+00> : vector<8x10xf32>
    %20 = tpu.matmul %19, %1, %cst_9 {dimension_numbers = #tpu.dot_dimension_numbers<[1], [0], [0], [1], [0, 0, 1, 1], [], []>} : vector<8x97xf32>, vector<97x10xf32>, vector<8x10xf32> -> vector<8x10xf32>
    %c1 = arith.constant 1 : index
    %c0_10 = arith.constant 0 : index
    %c0_11 = arith.constant 0 : index
    %21 = vector.load %arg3[%c1, %c0_10, %c0_11] : memref<2x10x128xf32, #tpu.memory_space<vmem>>, vector<1x10x128xf32>
    %22 = vector.shape_cast %21 : vector<1x10x128xf32> to vector<10x128xf32>
    %cst_12 = arith.constant dense<0.000000e+00> : vector<8x128xf32>
    %23 = tpu.matmul %20, %22, %cst_12 {dimension_numbers = #tpu.dot_dimension_numbers<[1], [0], [0], [1], [0, 0, 1, 1], [], []>} : vector<8x10xf32>, vector<10x128xf32>, vector<8x128xf32> -> vector<8x128xf32>
    %24 = arith.addf %14, %23 : vector<8x128xf32>
    %cst_13 = arith.constant 0.000000e+00 : f32
    %25 = vector.broadcast %cst_13 : f32 to vector<8x128xf32>
    %26 = arith.maximumf %24, %25 : vector<8x128xf32>
    %c0_14 = arith.constant 0 : index
    %c0_15 = arith.constant 0 : index
    %27 = vector.load %arg5[%c0_14, %c0_15] : memref<128x128xf32, #tpu.memory_space<vmem>>, vector<128x128xf32>
    %cst_16 = arith.constant dense<0.000000e+00> : vector<8x128xf32>
    %28 = tpu.matmul %26, %27, %cst_16 {dimension_numbers = #tpu.dot_dimension_numbers<[1], [0], [0], [1], [0, 0, 1, 1], [], []>} : vector<8x128xf32>, vector<128x128xf32>, vector<8x128xf32> -> vector<8x128xf32>
    %c0_17 = arith.constant 0 : index
    %c0_18 = arith.constant 0 : index
    %29 = vector.load %arg6[%c0_17, %c0_18] : memref<1x128xf32, #tpu.memory_space<vmem>>, vector<1x128xf32>
    %30 = vector.broadcast %29 : vector<1x128xf32> to vector<8x128xf32>
    %31 = arith.addf %28, %30 : vector<8x128xf32>
    %cst_19 = arith.constant dense<0xFF800000> : vector<8xf32>
    %32 = vector.multi_reduction <maximumf>, %31, %cst_19 [1] : vector<8x128xf32> to vector<8xf32>
    %33 = vector.shape_cast %32 : vector<8xf32> to vector<8x1xf32>
    %34 = vector.broadcast %33 : vector<8x1xf32> to vector<8x128xf32>
    %35 = arith.subf %31, %34 : vector<8x128xf32>
    %36 = math.exp %35 : vector<8x128xf32>
    %cst_20 = arith.constant dense<0.000000e+00> : vector<8xf32>
    %37 = vector.multi_reduction <add>, %36, %cst_20 [1] : vector<8x128xf32> to vector<8xf32>
    %38 = vector.shape_cast %37 : vector<8xf32> to vector<8x1xf32>
    %39 = math.log %38 : vector<8x1xf32>
    %40 = vector.broadcast %39 : vector<8x1xf32> to vector<8x128xf32>
    %41 = arith.subf %35, %40 : vector<8x128xf32>
    %c0_21 = arith.constant 0 : index
    %c0_22 = arith.constant 0 : index
    %42 = vector.load %arg7[%c0_21, %c0_22] : memref<8x128xf32, #tpu.memory_space<vmem>>, vector<8x128xf32>
    tpu.vector_store %arg7[%c0_21, %c0_22], %41 {strides = array<i32>} : memref<8x128xf32, #tpu.memory_space<vmem>>, vector<8x128xf32>,
    return
  }
  func.func @transform_0(%arg0: i32) -> (i32, i32) {
    %c0_i32 = arith.constant 0 : i32
    %c0_i32_0 = arith.constant 0 : i32
    return %arg0, %c0_i32 : i32, i32
  }
  func.func @transform_1(%arg0: i32) -> (i32, i32) {
    %c0_i32 = arith.constant 0 : i32
    %c0_i32_0 = arith.constant 0 : i32
    %c0_i32_1 = arith.constant 0 : i32
    return %c0_i32, %c0_i32_0 : i32, i32
  }
  func.func @transform_2(%arg0: i32) -> (i32, i32, i32) {
    %c0_i32 = arith.constant 0 : i32
    %c0_i32_0 = arith.constant 0 : i32
    %c0_i32_1 = arith.constant 0 : i32
    %c0_i32_2 = arith.constant 0 : i32
    return %c0_i32, %c0_i32_0, %c0_i32_1 : i32, i32, i32
  }
  func.func @transform_3(%arg0: i32) -> (i32, i32) {
    %c0_i32 = arith.constant 0 : i32
    %c0_i32_0 = arith.constant 0 : i32
    %c0_i32_1 = arith.constant 0 : i32
    return %c0_i32, %c0_i32_0 : i32, i32
  }
  func.func @transform_4(%arg0: i32) -> (i32, i32) {
    %c0_i32 = arith.constant 0 : i32
    %c0_i32_0 = arith.constant 0 : i32
    %c0_i32_1 = arith.constant 0 : i32
    return %c0_i32, %c0_i32_0 : i32, i32
  }
  func.func @transform_5(%arg0: i32) -> (i32, i32) {
    %c0_i32 = arith.constant 0 : i32
    %c0_i32_0 = arith.constant 0 : i32
    %c0_i32_1 = arith.constant 0 : i32
    return %c0_i32, %c0_i32_0 : i32, i32
  }
  func.func @transform_6(%arg0: i32) -> (i32, i32) {
    %c0_i32 = arith.constant 0 : i32
    %c0_i32_0 = arith.constant 0 : i32
    return %arg0, %c0_i32 : i32, i32
  }
}

</mosaic_0001>

<bundles_post_ra>
// kernel: tpu_custom_call.1
= control target key start
LH: loop header
LB: loop body
LE: loop exit
PB: predicated region body
PF: predicated region fallthrough
CT: control target
= control target key end

     0   :  { %v770_v3 = vmov 0   ;;  %v771_v4 = vmov 0.0|0.0   ;;  %vm772_vm0 = vmmov 0   ;;  %v773_v9 = vmov 0.0   ;;  %s982_s0 = inlined_call_operand.vmem [shape: s32[8,2], index: 0, kind: input, shape index: {}]   ;;  %s983_s1 = inlined_call_operand.vmem [shape: f32[97,10], index: 1, kind: input, shape index: {}]   ;;  %s984_s2 = inlined_call_operand.vmem [shape: f32[2,10,128], index: 2, kind: input, shape index: {}]   ;;  %s985_s3 = inlined_call_operand.vmem [shape: f32[1,128], index: 3, kind: input, shape index: {}]   ;;  %s986_s4 = inlined_call_operand.vmem [shape: f32[128,128], index: 4, kind: input, shape index: {}]   ;;  %s987_s5 = inlined_call_operand.vmem [shape: f32[1,128], index: 5, kind: input, shape index: {}]   ;;  %s988_s6 = inlined_call_operand.hbm [shape: f32[8,128], index: 6, kind: output, shape index: {}]  }
   0x1   :  { %v24_v0 = vld [vmem:[%s982_s0] sm:$0xff]  ;;  %v26_v2 = vld [vmem:[%s983_s1 + $0x8] sm:$0xff]  ;;  %740 = vset.pattern.permute.xlu0 %v770_v3  ;;  %662 = vmatprep.subr.bf16.mxu0 %v771_v4  ;;  %v27_v6 = vld [vmem:[%s983_s1 + $0x10] sm:$0xff]  ;;  %vm131_vm1 = vcmask 1041408  }
   0x2   :  { %v25_v1 = vld [vmem:[%s983_s1] sm:$0xff]  ;;  %v28_v7 = vld [vmem:[%s983_s1 + $0x18] sm:$0xff]  ;;  %42 = vperm.xlu0 %740, %v24_v0   ;;  %680 = vmatprep.subr.bf16.mxu1 %v771_v4  ;;  %v30_v11 = vld [vmem:[%s983_s1 + $0x28] sm:$0xff] }
   0x3   :  { %v663_v5 = vpack.c.bf16 %v26_v2, %v25_v1  ;;  %v666_v8 = vpack.c.bf16 %v28_v7, %v27_v6  ;;  %581 = vmatprep.mubr.msk.f32.mxu0 %vm772_vm0, %v773_v9  ;;  %v29_v10 = vld [vmem:[%s983_s1 + $0x20] sm:$0xff]  ;;  %588 = vmatprep.mubr.msk.f32.mxu1 %vm772_vm0, %v773_v9  ;;  %v126_v13 = vld [vmem:[%s984_s2 + $0x8] sm:$0x3] }
   0x4   :  { %v125_v12 = vld [vmem:[%s984_s2] sm:$0xff] }
   0x5   :  { %664 = vmatpush3.bf16.msra.mxu0 %v663_v5 }
   0x6   :  { %665 = vmatprep.subr.bf16.mxu0 %v771_v4 }
   0x7   :  { %11 = vsyncpa [#allocation3], 0  ;;  %v774_v14 = vmov 1   ;;  %v681_v15 = vpack.c.bf16 %v126_v13, %v125_v12  ;;  %vm775_vm2 = vmmov 1   ;;  %v669_v17 = vpack.c.bf16 %v30_v11, %v29_v10  ;;  %v31_v18 = vld [vmem:[%s983_s1 + $0x30] sm:$0xff]  ;;  %v32_v19 = vld [vmem:[%s983_s1 + $0x38] sm:$0xff] }
   0x8   :  { %741 = vset.pattern.permute.xlu0 %v774_v14  ;;  %vm846_vm3 = vmpackc.low %vm131_vm1, %vm775_vm2  ;;  %v672_v20 = vpack.c.bf16 %v32_v19, %v31_v18  ;;  %v33_v21 = vld [vmem:[%s983_s1 + $0x40] sm:$0xff]  ;;  %v34_v22 = vld [vmem:[%s983_s1 + $0x48] sm:$0xff]  ;;  %vm51_vm4 = vcmask 1040384   ;;  %v39_v28 = vlaneseq  ;;  %vm47_vm5 = vcmask 793600  }
   0x9   :  { %667 = vmatpush3.bf16.msra.mxu0 %v666_v8  ;;  %213 = vperm.xlu0 %741, %v24_v0   ;;  %v675_v23 = vpack.c.bf16 %v34_v22, %v33_v21  ;;  %v35_v24 = vld [vmem:[%s983_s1 + $0x50] sm:$0xff]  ;;  %v36_v25 = vld [vmem:[%s983_s1 + $0x58] sm:$0xff]  ;;  %v37_v27 = vld [vmem:[%s983_s1 + $0x60] sm:$0x1]  ;;  %vm127_vm7 = vcmask 80896  }
   0xa   :  { %668 = vmatprep.subr.bf16.mxu0 %v771_v4  ;;  %683 = vmatpush3.bf16.msk.msra.mxu1 %vm846_vm3, %v681_v15  ;;  %v678_v26 = vpack.c.bf16 %v36_v25, %v35_v24  ;;  %v40_v29 = vand.u32 127, %v39_v28  ;;  %v499_v35 = vld [vmem:[%s984_s2 + $0x10] sm:$0xff]  ;;  %v500_v36 = vld [vmem:[%s984_s2 + $0x18] sm:$0x3]  ;;  %v372_v39 = vld [vmem:[%s986_s4] sm:$0xff] }
   0xb   :  { %684 = vmatprep.subr.bf16.mxu1 %v771_v4  ;;  %v703_v38 = vpack.c.bf16 %v500_v36, %v499_v35  ;;  %v373_v40 = vld [vmem:[%s986_s4 + $0x8] sm:$0xff]  ;;  %v374_v41 = vld [vmem:[%s986_s4 + $0x10] sm:$0xff]  ;;  %v375_v43 = vld [vmem:[%s986_s4 + $0x18] sm:$0xff] }
   0xc   :  { %v707_v42 = vpack.c.bf16 %v373_v40, %v372_v39  ;;  %v710_v44 = vpack.c.bf16 %v375_v43, %v374_v41  ;;  %v376_v45 = vld [vmem:[%s986_s4 + $0x20] sm:$0xff]  ;;  %v377_v46 = vld [vmem:[%s986_s4 + $0x28] sm:$0xff]  ;;  %v378_v48 = vld [vmem:[%s986_s4 + $0x30] sm:$0xff] }
   0xd   :  { %670 = vmatpush3.bf16.msra.mxu0 %v669_v17  ;;  %v713_v47 = vpack.c.bf16 %v377_v46, %v376_v45  ;;  %v379_v49 = vld [vmem:[%s986_s4 + $0x38] sm:$0xff]  ;;  %v380_v51 = vld [vmem:[%s986_s4 + $0x40] sm:$0xff]  ;;  %v381_v52 = vld [vmem:[%s986_s4 + $0x48] sm:$0xff] }
   0xe   :  { %671 = vmatprep.subr.bf16.mxu0 %v771_v4  ;;  %v716_v50 = vpack.c.bf16 %v379_v49, %v378_v48  ;;  %v719_v53 = vpack.c.bf16 %v381_v52, %v380_v51  ;;  %v382_v54 = vld [vmem:[%s986_s4 + $0x50] sm:$0xff]  ;;  %v383_v55 = vld [vmem:[%s986_s4 + $0x58] sm:$0xff]  ;;  %v384_v57 = vld [vmem:[%s986_s4 + $0x60] sm:$0xff] }
   0xf   :  { %v722_v56 = vpack.c.bf16 %v383_v55, %v382_v54  ;;  %v385_v58 = vld [vmem:[%s986_s4 + $0x68] sm:$0xff]  ;;  %v386_v62 = vld [vmem:[%s986_s4 + $0x70] sm:$0xff]  ;;  %v387_v63 = vld [vmem:[%s986_s4 + $0x78] sm:$0xff] }
  0x10   :  { %v725_v59 = vpack.c.bf16 %v385_v58, %v384_v57  ;;  %v728_v0 = vpack.c.bf16 %v387_v63, %v386_v62  ;;  %v495_v1 = vld [vmem:[%s985_s3] ss:$0 sm:$0xff]  ;;  %s776_s3 = smov [#allocation2]  }
  0x11   :  { %673 = vmatpush3.bf16.msra.mxu0 %v672_v20  ;;  %v503_v6 = vld [vmem:[%s987_s5] ss:$0 sm:$0xff]  ;;  %s482_s4 = sshll.u32 %s776_s3, 4  ;;  %s483_s4 = int_to_ptr.vmem [resolvable:$true] %s482_s4 }
  0x12   :  { %674 = vmatprep.subr.bf16.mxu0 %v771_v4  ;;  %s746_s5 = scalar_lea.vmem %s483_s4, 128  ;;  %p751_p1 = scmp.lt.s32.totalorder %s483_s4, %s483_s4 }
  0x13   :  { %p747_p0 = scmp.ne.s32.totalorder %s483_s4, %s746_s5  ;;  %p752_p2 = scmp.lt.s32.totalorder %s746_s5, %s746_s5 }
  0x15   :  { %676 = vmatpush3.bf16.msra.mxu0 %v675_v23  ;;  %p753_p3 = por %p752_p2, %p751_p1 }
  0x16   :  { %677 = vmatprep.subr.bf16.mxu0 %v771_v4 }
  0x17   :  { %p754_p4 = pnand %p753_p3, %p747_p0 }
  0x19   :  { %679 = vmatpush3.bf16.msra.mxu0 %v678_v26 }
  0x1a   :  { %579 = vmatprep.subr.mxu0 %v773_v9 }
  0x1d   :  { %580 = vmatpush3.msk.msra.mxu0 %vm51_vm4, %v37_v27 }
  0x1e   :  { %706 = vmatprep.subr.bf16.mxu0 %v771_v4 }
  0x81   :  { %v43_v30 = vpop.permute.xlu0 %42 }
  0x82   :  { %vm44_vm6 = vcmp.eq.s32.totalorder %v43_v30, %v40_v29 }
  0x83   :  { %v490_v31 = vsel %vm44_vm6, 1.0, %v773_v9 }
  0x84   :  { %582 = vmatmul.mubr.msk.f32.vlgmr.msra.gmra.mrb[0].mxu0 %vm47_vm5, %v490_v31 }
  0x85   :  { %659 = vmatprep.mubr.msk.f32.mxu0 %vm772_vm0, %v773_v9  ;;  %708 = vmatpush3.bf16.msra.mxu0 %v707_v42 }
  0x86   :  { %709 = vmatprep.subr.bf16.mxu0 %v771_v4 }
  0x88   :  { %v214_v34 = vpop.permute.xlu0 %213 }
  0x89   :  { %vm215_vm8 = vcmp.eq.s32.totalorder %v214_v34, %v40_v29  ;;  %711 = vmatpush3.bf16.msra.mxu0 %v710_v44 }
  0x8a   :  { %v496_v37 = vsel %vm215_vm8, 1.0, %v773_v9  ;;  %712 = vmatprep.subr.bf16.mxu0 %v771_v4 }
  0x8d   :  { %714 = vmatpush3.bf16.msra.mxu0 %v713_v47 }
  0x8e   :  { %715 = vmatprep.subr.bf16.mxu0 %v771_v4 }
  0x91   :  { %717 = vmatpush3.bf16.msra.mxu0 %v716_v50 }
  0x92   :  { %718 = vmatprep.subr.bf16.mxu0 %v771_v4 }
  0x95   :  { %720 = vmatpush3.bf16.msra.mxu0 %v719_v53 }
  0x96   :  { %721 = vmatprep.subr.bf16.mxu0 %v771_v4 }
  0x99   :  { %723 = vmatpush3.bf16.msra.mxu0 %v722_v56 }
  0x9a   :  { %724 = vmatprep.subr.bf16.mxu0 %v771_v4 }
  0x9d   :  { %726 = vmatpush3.bf16.msra.mxu0 %v725_v59 }
  0x9e   :  { %727 = vmatprep.subr.bf16.mxu0 %v771_v4 }
  0xa1   :  { %729 = vmatpush3.bf16.msra.mxu0 %v728_v0 }
 0x157   :  { %v121_v32 = vpop.f32.mrb[0].mxu0 }
 0x158   :  { %v583_v33 = vpop.f32.mrb[1].mxu0  ;;  %589 = vmatmul.mubr.msk.f32.vlgmr.msra.gmra.mrb[0].mxu1 %vm127_vm7, %v121_v32 }
 0x159   :  { %686 = vmatpush3.bf16.msra.mxu1 %v663_v5  ;;  %617 = vmatprep.mubr.msk.f32.mxu1 %vm772_vm0, %v773_v9 }
 0x15a   :  { %687 = vmatprep.subr.bf16.mxu1 %v771_v4 }
 0x15d   :  { %689 = vmatpush3.bf16.msra.mxu1 %v666_v8 }
 0x15e   :  { %690 = vmatprep.subr.bf16.mxu1 %v771_v4 }
 0x161   :  { %692 = vmatpush3.bf16.msra.mxu1 %v669_v17 }
 0x162   :  { %693 = vmatprep.subr.bf16.mxu1 %v771_v4 }
 0x165   :  { %695 = vmatpush3.bf16.msra.mxu1 %v672_v20 }
 0x166   :  { %696 = vmatprep.subr.bf16.mxu1 %v771_v4 }
 0x169   :  { %698 = vmatpush3.bf16.msra.mxu1 %v675_v23 }
 0x16a   :  { %699 = vmatprep.subr.bf16.mxu1 %v771_v4 }
 0x16d   :  { %701 = vmatpush3.bf16.msra.mxu1 %v678_v26 }
 0x16e   :  { %615 = vmatprep.subr.mxu1 %v773_v9 }
 0x171   :  { %616 = vmatpush3.msk.msra.mxu1 %vm51_vm4, %v37_v27 }
 0x172   :  { %618 = vmatmul.mubr.msk.f32.vlgmr.msra.gmra.mrb[2].mxu1 %vm47_vm5, %v496_v37  ;;  %702 = vmatprep.subr.bf16.mxu1 %v771_v4 }
 0x173   :  { %705 = vmatpush3.bf16.msk.msra.mxu1 %vm846_vm3, %v703_v38  ;;  %624 = vmatprep.mubr.msk.f32.mxu1 %vm772_vm0, %v773_v9 }
 0x245   :  { %v287_v60 = vpop.f32.mrb[2].mxu1 }
 0x246   :  { %v619_v61 = vpop.f32.mrb[3].mxu1  ;;  %625 = vmatmul.mubr.msk.f32.vlgmr.msra.gmra.mrb[0].mxu1 %vm127_vm7, %v287_v60 }
 0x319   :  { %v366_v2 = vpop.f32.mrb[0].mxu1 }
 0x31a   :  { %v730_v3 = vadd.f32 %v495_v1, %v366_v2  ;;  %v626_v4 = vpop.f32.mrb[1].mxu1 }
 0x31c   :  { %v371_v5 = vmax.f32 %v730_v3, 0.0 }
 0x31e   :  { %660 = vmatmul.mubr.f32.vlgmr.msra.gmra.mrb[2].mxu0 %v371_v5 }
 0x3f1   :  { %v461_v7 = vpop.f32.mrb[2].mxu0 }
 0x3f2   :  { %v462_v8 = vadd.f32 %v503_v6, %v461_v7  ;;  %v661_v9 = vpop.f32.mrb[3].mxu0 }
 0x3f4   :  { %465 = vmax.xlane.f32.xlu1 %v462_v8 }
 0x481   :  { %v466_v10 = vpop.xlane.xlu1 %465 }
 0x482   :  { %v467_v11 = vsub.f32 %v462_v8, %v466_v10 }
 0x484   :  { %v468_v12 = vmul.f32 1.442695, %v467_v11 }
 0x486   :  { %742 = vpow2.f32 %v468_v12 }
 0x490   :  { %v743_v13 = vpop.eup %742 }
 0x491   :  { %470 = vadd.xlane.f32.xlu1 %v743_v13 }
 0x51e   :  { %v471_v14 = vpop.xlane.xlu1 %470 }
 0x51f   :  { %744 = vlog2.f32 %v471_v14 }
 0x529   :  { %v745_v15 = vpop.eup %744 }
 0x52a   :  { %v473_v16 = vmul.f32 0.6931472, %v745_v15 }
 0x52c   :  { %v474_v17 = vsub.f32 %v467_v11, %v473_v16 }
 0x52e   :  { %475 = vst [vmem:[#allocation2] sm:$0xff] %v474_v17 }
 0x52f   :  { %757 = shalt.err (!%p754_p4)
}
 0x530   :  { %s758_s16 = scalar_lea.hbm %s988_s6, 128 }
 0x531   :  { %p759_p5 = scmp.ne.s32.totalorder %s988_s6, %s758_s16  ;;  %p762_p6 = scmp.lt.u32.totalorder %s758_s16, %s988_s6 }
 0x533   :  { %p764_p7 = pnand %p762_p6, %p759_p5 }
 0x535   :  { %767 = shalt.err (!%p764_p7)
}
 0x536   :  { %485 = dma.vmem_to_hbm [thread:$0]  %s483_s4, 128, %s988_s6, [#allocation3]  }
 0x537   :  { %768 = dma.done.wait [#allocation3], 128  }
 0x538   :  { %769 = vsyncadd [#allocation3], 4294967168 }
 0x539   :  { %489 = vsyncpa [#allocation3], 1 }

</bundles_post_ra>
